<compile_context>
chip_gen: v7x
topology: tpu7x:2x2x1
jax: 0.10.0
libtpu: 0.0.40
codegen_flags: <defaults>
</compile_context>

<pallas_src>
import jax
import jax.numpy as jnp
from jax.experimental import pallas as pl
from jax.experimental.pallas import tpu as pltpu

D_MODEL = 64
D_PAD = 128          # lane-dense K for the first matmul
DIM_FF = 512
NUM_CLASSES = 2
OUT_PAD = 128        # lane-dense N for the last matmul / output store
MAX_TB = 512         # row tile sized against v7x (64 MiB phys / 32 MiB scoped VMEM)


def ffn_kernel(x_ref, w1_ref, b1_ref, w2_ref, b2_ref, w3_ref, b3_ref, o_ref):
    # Fused 3-layer MLP on one (TB, D_PAD) row tile; intermediates never touch HBM.
    x = x_ref[...]                                                     # bf16
    h1 = jnp.dot(x, w1_ref[...], preferred_element_type=jnp.float32) + b1_ref[...]
    h1 = jnp.maximum(h1, 0.0).astype(jnp.bfloat16)
    # TODO(synk): dropout1 is identity (eval mode); no RNG masking applied.
    h2 = jnp.dot(h1, w2_ref[...], preferred_element_type=jnp.float32) + b2_ref[...]
    h2 = jnp.maximum(h2, 0.0).astype(jnp.bfloat16)
    # TODO(synk): dropout2 is identity (eval mode); no RNG masking applied.
    out = jnp.dot(h2, w3_ref[...], preferred_element_type=jnp.float32) + b3_ref[...]
    o_ref[...] = out.astype(o_ref.dtype)


def _round_up(n, m):
    return ((n + m - 1) // m) * m


def feed_forward(x, params):
    """x: (B, S, d_model) with S == 1 (matches the torch squeeze(dim=1)).
    Returns (B, num_classes) in float32."""
    w1, b1, w2, b2, w3, b3 = params
    B, S, D = x.shape
    assert S == 1 and D == D_MODEL
    rows = B * S

    # Row tile: a single grid step for small batches (no per-step overhead),
    # 512-row tiles for large batches so we never blow the scoped VMEM limit
    # and x/out DMAs double-buffer against compute.
    if rows <= MAX_TB:
        tb = max(8, _round_up(rows, 8))
    else:
        tb = MAX_TB
    rows_padded = _round_up(rows, tb)

    # Pad rows to a tile multiple and K from 64 -> 128 lanes (zeros are inert).
    x2d = x.reshape(rows, D).astype(jnp.bfloat16)
    x2d = jnp.pad(x2d, ((0, rows_padded - rows), (0, D_PAD - D)))

    grid = (rows_padded // tb,)
    resident = lambda i: (0, 0)   # weights/biases: same block every grid step

    out = pl.pallas_call(
        ffn_kernel,
        out_shape=jax.ShapeDtypeStruct((rows_padded, OUT_PAD), jnp.float32),
        grid=grid,
        in_specs=[
            pl.BlockSpec((tb, D_PAD), lambda i: (i, 0)),      # x row tile (streams)
            pl.BlockSpec((D_PAD, DIM_FF), resident),          # w1 (resident)
            pl.BlockSpec((1, DIM_FF), resident),              # b1
            pl.BlockSpec((DIM_FF, DIM_FF), resident),         # w2
            pl.BlockSpec((1, DIM_FF), resident),              # b2
            pl.BlockSpec((DIM_FF, OUT_PAD), resident),        # w3 (lane-padded)
            pl.BlockSpec((1, OUT_PAD), resident),             # b3 (lane-padded)
        ],
        out_specs=pl.BlockSpec((tb, OUT_PAD), lambda i: (i, 0)),
        compiler_params=pltpu.CompilerParams(
            dimension_semantics=("parallel",)),  # v7x: shard row tiles across 2 TCs
    )(x2d, w1, b1, w2, b2, w3, b3)

    # Drop row padding and the lane padding of the last layer.
    # torch: out.squeeze(dim=1) -> (B, num_classes); already 2-D here.
    return out[:rows, :NUM_CLASSES]


def init_params(key):
    """torch.nn.Linear default init (U(-1/sqrt(fan_in), +)), stored (in, out) so
    the kernel does x @ W. Weights in bf16 (f32 accumulation in-kernel); w1's K
    and the last layer's N are zero-padded to lane-dense sizes."""
    ks = jax.random.split(key, 6)

    def linear(kw, kb, fan_in, fan_out):
        bound = 1.0 / jnp.sqrt(fan_in)
        w = jax.random.uniform(kw, (fan_in, fan_out), jnp.float32, -bound, bound)
        b = jax.random.uniform(kb, (1, fan_out), jnp.float32, -bound, bound)
        return w, b

    w1, b1 = linear(ks[0], ks[1], D_MODEL, DIM_FF)
    w2, b2 = linear(ks[2], ks[3], DIM_FF, DIM_FF)
    w3, b3 = linear(ks[4], ks[5], DIM_FF, NUM_CLASSES)

    # Zero-pad w1 K: 64 -> 128 (x is zero-padded to match -> result unchanged).
    w1 = jnp.pad(w1, ((0, D_PAD - D_MODEL), (0, 0)))
    # Zero-pad the output layer N: 2 -> 128 so the final store is lane-dense.
    w3 = jnp.pad(w3, ((0, 0), (0, OUT_PAD - NUM_CLASSES)))
    b3 = jnp.pad(b3, ((0, 0), (0, OUT_PAD - NUM_CLASSES)))

    return (w1.astype(jnp.bfloat16), b1,
            w2.astype(jnp.bfloat16), b2,
            w3.astype(jnp.bfloat16), b3)


if __name__ == "__main__":
    key = jax.random.PRNGKey(0)
    k_param, k_x = jax.random.split(key)
    params = init_params(k_param)

    B = 8
    x = jax.random.normal(k_x, (B, 1, D_MODEL), jnp.float32)

    out = jax.block_until_ready(feed_forward(x, params))
    assert out.shape == (B, NUM_CLASSES)

    # Pure-JAX reference mirroring the kernel arithmetic (bf16 operands, f32 acc).
    w1, b1, w2, b2, w3, b3 = params
    xb = jnp.pad(x.reshape(B, D_MODEL),
                 ((0, 0), (0, D_PAD - D_MODEL))).astype(jnp.bfloat16)
    h = jnp.dot(xb, w1, preferred_element_type=jnp.float32) + b1
    h = jnp.maximum(h, 0.0).astype(jnp.bfloat16)
    h = jnp.dot(h, w2, preferred_element_type=jnp.float32) + b2
    h = jnp.maximum(h, 0.0).astype(jnp.bfloat16)
    ref = (jnp.dot(h, w3, preferred_element_type=jnp.float32) + b3)[:, :NUM_CLASSES]

    assert jnp.allclose(out, ref, atol=1e-3, rtol=1e-3), \
        float(jnp.max(jnp.abs(out - ref)))

    print("KERNEL_OK")
</pallas_src>

<mosaic_0001>
module attributes {stable_mosaic.version = 11 : i64} {
  func.func @ffn_kernel(%arg0: i32, %arg1: memref<8x128xbf16, #tpu.memory_space<vmem>>, %arg2: memref<128x512xbf16, #tpu.memory_space<vmem>>, %arg3: memref<1x512xf32, #tpu.memory_space<vmem>>, %arg4: memref<512x512xbf16, #tpu.memory_space<vmem>>, %arg5: memref<1x512xf32, #tpu.memory_space<vmem>>, %arg6: memref<512x128xbf16, #tpu.memory_space<vmem>>, %arg7: memref<1x128xf32, #tpu.memory_space<vmem>>, %arg8: memref<8x128xf32, #tpu.memory_space<vmem>>) attributes {dimension_semantics = [#tpu.dimension_semantics<parallel>], iteration_bounds = array<i64: 1>, scalar_prefetch = 0 : i64, scratch_operands = 0 : i64, tpu.core_type = #tpu.core_type<tc>, window_params = [{transform_indices = @transform_0, window_bounds = array<i64: 8, 128>}, {pipeline_mode = #tpu.pipeline_mode<synchronous>, transform_indices = @transform_1, window_bounds = array<i64: 128, 512>}, {pipeline_mode = #tpu.pipeline_mode<synchronous>, transform_indices = @transform_2, window_bounds = array<i64: 1, 512>}, {pipeline_mode = #tpu.pipeline_mode<synchronous>, transform_indices = @transform_3, window_bounds = array<i64: 512, 512>}, {pipeline_mode = #tpu.pipeline_mode<synchronous>, transform_indices = @transform_4, window_bounds = array<i64: 1, 512>}, {pipeline_mode = #tpu.pipeline_mode<synchronous>, transform_indices = @transform_5, window_bounds = array<i64: 512, 128>}, {pipeline_mode = #tpu.pipeline_mode<synchronous>, transform_indices = @transform_6, window_bounds = array<i64: 1, 128>}, {transform_indices = @transform_7, window_bounds = array<i64: 8, 128>}]} {
    %c0 = arith.constant 0 : index
    %c0_0 = arith.constant 0 : index
    %0 = vector.load %arg1[%c0, %c0_0] : memref<8x128xbf16, #tpu.memory_space<vmem>>, vector<8x128xbf16>
    %c0_1 = arith.constant 0 : index
    %c0_2 = arith.constant 0 : index
    %1 = vector.load %arg2[%c0_1, %c0_2] : memref<128x512xbf16, #tpu.memory_space<vmem>>, vector<128x512xbf16>
    %cst = arith.constant dense<0.000000e+00> : vector<8x512xf32>
    %2 = tpu.matmul %0, %1, %cst {dimension_numbers = #tpu.dot_dimension_numbers<[1], [0], [0], [1], [0, 0, 1, 1], [], []>} : vector<8x128xbf16>, vector<128x512xbf16>, vector<8x512xf32> -> vector<8x512xf32>
    %c0_3 = arith.constant 0 : index
    %c0_4 = arith.constant 0 : index
    %3 = vector.load %arg3[%c0_3, %c0_4] : memref<1x512xf32, #tpu.memory_space<vmem>>, vector<1x512xf32>
    %4 = vector.broadcast %3 : vector<1x512xf32> to vector<8x512xf32>
    %5 = arith.addf %2, %4 : vector<8x512xf32>
    %cst_5 = arith.constant 0.000000e+00 : f32
    %6 = vector.broadcast %cst_5 : f32 to vector<8x512xf32>
    %7 = arith.maximumf %5, %6 : vector<8x512xf32>
    %8 = arith.truncf %7 : vector<8x512xf32> to vector<8x512xbf16>
    %c0_6 = arith.constant 0 : index
    %c0_7 = arith.constant 0 : index
    %9 = vector.load %arg4[%c0_6, %c0_7] : memref<512x512xbf16, #tpu.memory_space<vmem>>, vector<512x512xbf16>
    %cst_8 = arith.constant dense<0.000000e+00> : vector<8x512xf32>
    %10 = tpu.matmul %8, %9, %cst_8 {dimension_numbers = #tpu.dot_dimension_numbers<[1], [0], [0], [1], [0, 0, 1, 1], [], []>} : vector<8x512xbf16>, vector<512x512xbf16>, vector<8x512xf32> -> vector<8x512xf32>
    %c0_9 = arith.constant 0 : index
    %c0_10 = arith.constant 0 : index
    %11 = vector.load %arg5[%c0_9, %c0_10] : memref<1x512xf32, #tpu.memory_space<vmem>>, vector<1x512xf32>
    %12 = vector.broadcast %11 : vector<1x512xf32> to vector<8x512xf32>
    %13 = arith.addf %10, %12 : vector<8x512xf32>
    %cst_11 = arith.constant 0.000000e+00 : f32
    %14 = vector.broadcast %cst_11 : f32 to vector<8x512xf32>
    %15 = arith.maximumf %13, %14 : vector<8x512xf32>
    %16 = arith.truncf %15 : vector<8x512xf32> to vector<8x512xbf16>
    %c0_12 = arith.constant 0 : index
    %c0_13 = arith.constant 0 : index
    %17 = vector.load %arg6[%c0_12, %c0_13] : memref<512x128xbf16, #tpu.memory_space<vmem>>, vector<512x128xbf16>
    %cst_14 = arith.constant dense<0.000000e+00> : vector<8x128xf32>
    %18 = tpu.matmul %16, %17, %cst_14 {dimension_numbers = #tpu.dot_dimension_numbers<[1], [0], [0], [1], [0, 0, 1, 1], [], []>} : vector<8x512xbf16>, vector<512x128xbf16>, vector<8x128xf32> -> vector<8x128xf32>
    %c0_15 = arith.constant 0 : index
    %c0_16 = arith.constant 0 : index
    %19 = vector.load %arg7[%c0_15, %c0_16] : memref<1x128xf32, #tpu.memory_space<vmem>>, vector<1x128xf32>
    %20 = vector.broadcast %19 : vector<1x128xf32> to vector<8x128xf32>
    %21 = arith.addf %18, %20 : vector<8x128xf32>
    %c0_17 = arith.constant 0 : index
    %c0_18 = arith.constant 0 : index
    %22 = vector.load %arg8[%c0_17, %c0_18] : memref<8x128xf32, #tpu.memory_space<vmem>>, vector<8x128xf32>
    tpu.vector_store %arg8[%c0_17, %c0_18], %21 {strides = array<i32>} : memref<8x128xf32, #tpu.memory_space<vmem>>, vector<8x128xf32>,
    return
  }
  func.func @transform_0(%arg0: i32) -> (i32, i32) {
    %c0_i32 = arith.constant 0 : i32
    %c0_i32_0 = arith.constant 0 : i32
    return %arg0, %c0_i32 : i32, i32
  }
  func.func @transform_1(%arg0: i32) -> (i32, i32) {
    %c0_i32 = arith.constant 0 : i32
    %c0_i32_0 = arith.constant 0 : i32
    %c0_i32_1 = arith.constant 0 : i32
    return %c0_i32, %c0_i32_0 : i32, i32
  }
  func.func @transform_2(%arg0: i32) -> (i32, i32) {
    %c0_i32 = arith.constant 0 : i32
    %c0_i32_0 = arith.constant 0 : i32
    %c0_i32_1 = arith.constant 0 : i32
    return %c0_i32, %c0_i32_0 : i32, i32
  }
  func.func @transform_3(%arg0: i32) -> (i32, i32) {
    %c0_i32 = arith.constant 0 : i32
    %c0_i32_0 = arith.constant 0 : i32
    %c0_i32_1 = arith.constant 0 : i32
    return %c0_i32, %c0_i32_0 : i32, i32
  }
  func.func @transform_4(%arg0: i32) -> (i32, i32) {
    %c0_i32 = arith.constant 0 : i32
    %c0_i32_0 = arith.constant 0 : i32
    %c0_i32_1 = arith.constant 0 : i32
    return %c0_i32, %c0_i32_0 : i32, i32
  }
  func.func @transform_5(%arg0: i32) -> (i32, i32) {
    %c0_i32 = arith.constant 0 : i32
    %c0_i32_0 = arith.constant 0 : i32
    %c0_i32_1 = arith.constant 0 : i32
    return %c0_i32, %c0_i32_0 : i32, i32
  }
  func.func @transform_6(%arg0: i32) -> (i32, i32) {
    %c0_i32 = arith.constant 0 : i32
    %c0_i32_0 = arith.constant 0 : i32
    %c0_i32_1 = arith.constant 0 : i32
    return %c0_i32, %c0_i32_0 : i32, i32
  }
  func.func @transform_7(%arg0: i32) -> (i32, i32) {
    %c0_i32 = arith.constant 0 : i32
    %c0_i32_0 = arith.constant 0 : i32
    return %arg0, %c0_i32 : i32, i32
  }
}

</mosaic_0001>

<bundles_post_ra>
// kernel: tpu_custom_call.1
= control target key start
LH: loop header
LB: loop body
LE: loop exit
PB: predicated region body
PF: predicated region fallthrough
CT: control target
= control target key end

     0   :  { %12 = vsyncpa [#allocation3], 0  ;;  %s2514_s0 = inlined_call_operand.hbm [shape: bf16[8,128], index: 0, kind: input, shape index: {}]   ;;  %s2515_s1 = inlined_call_operand.hbm [shape: bf16[128,512], index: 1, kind: input, shape index: {}]   ;;  %s2516_s2 = inlined_call_operand.vmem [shape: f32[1,512], index: 2, kind: input, shape index: {}]   ;;  %s2517_s3 = inlined_call_operand.hbm [shape: bf16[512,512], index: 3, kind: input, shape index: {}]   ;;  %s2518_s4 = inlined_call_operand.vmem [shape: f32[1,512], index: 4, kind: input, shape index: {}]   ;;  %s2519_s5 = inlined_call_operand.hbm [shape: bf16[512,128], index: 5, kind: input, shape index: {}]   ;;  %s2520_s6 = inlined_call_operand.vmem [shape: f32[1,128], index: 6, kind: input, shape index: {}]   ;;  %s2521_s7 = inlined_call_operand.hbm [shape: f32[8,128], index: 7, kind: output, shape index: {}]  }
   0x1   :  { %13 = vsyncpa [#allocation6], 0 }
   0x2   :  { %14 = vsyncpa [#allocation9], 0 }
   0x3   :  { %15 = vsyncpa [#allocation4], 0  ;;  %s2358_s24 = smov [#allocation5]   ;;  %s2240_s28 = scalar_lea.hbm %s2515_s1, 4096 }
   0x4   :  { %s31_s25 = sshll.u32 %s2358_s24, 4  ;;  %p2241_p0 = scmp.ne.s32.totalorder %s2515_s1, %s2240_s28  ;;  %s32_s25 = int_to_ptr.vmem [resolvable:$true] %s31_s25 }
   0x5   :  { %p2244_p1 = scmp.lt.u32.totalorder %s2240_s28, %s2515_s1 }
   0x7   :  { %p2246_p2 = pnand %p2244_p1, %p2241_p0 }
   0x9   :  { %2249 = shalt.err (!%p2246_p2)
}
   0xa   :  { %s2250_s10 = scalar_lea.vmem %s32_s25, 4096  ;;  %p2255_p4 = scmp.lt.s32.totalorder %s32_s25, %s32_s25 }
   0xb   :  { %p2251_p3 = scmp.ne.s32.totalorder %s32_s25, %s2250_s10  ;;  %p2256_p5 = scmp.lt.s32.totalorder %s2250_s10, %s2250_s10 }
   0xd   :  { %p2257_p6 = por %p2256_p5, %p2255_p4 }
   0xf   :  { %p2258_p7 = pnand %p2257_p6, %p2251_p3 }
  0x11   :  { %2261 = shalt.err (!%p2258_p7)
}
  0x12   :  { %s2359_s11 = smov 256   ;;  %s2360_s12 = smov 16  }
  0x13   :  { %37 = dma.hbm_to_vmem [thread:$0]  %s2515_s1, 4096, %s32_s25, [#allocation6], %s2359_s11, %s2359_s11, %s2360_s12  }
  0x14   :  { %s2361_s15 = smov [#allocation2]   ;;  %s2362_s17 = smov [#allocation7]  }
  0x15   :  { %s22_s16 = sshll.u32 %s2361_s15, 4  ;;  %s45_s18 = sshll.u32 %s2362_s17, 4  ;;  %s23_s16 = int_to_ptr.vmem [resolvable:$true] %s22_s16  ;;  %s46_s18 = int_to_ptr.vmem [resolvable:$true] %s45_s18 }
  0x16   :  { %s2262_s21 = scalar_lea.hbm %s2514_s0, 64 }
  0x17   :  { %p2263_p8 = scmp.ne.s32.totalorder %s2514_s0, %s2262_s21  ;;  %p2266_p9 = scmp.lt.u32.totalorder %s2262_s21, %s2514_s0 }
  0x19   :  { %p2268_p10 = pnand %p2266_p9, %p2263_p8 }
  0x1b   :  { %2271 = shalt.err (!%p2268_p10)
}
  0x1c   :  { %s2272_s1 = scalar_lea.vmem %s23_s16, 64  ;;  %p2277_p12 = scmp.lt.s32.totalorder %s23_s16, %s23_s16 }
  0x1d   :  { %p2273_p11 = scmp.ne.s32.totalorder %s23_s16, %s2272_s1  ;;  %p2278_p13 = scmp.lt.s32.totalorder %s2272_s1, %s2272_s1 }
  0x1f   :  { %p2279_p0 = por %p2278_p13, %p2277_p12 }
  0x21   :  { %p2280_p1 = pnand %p2279_p0, %p2273_p11 }
  0x23   :  { %2283 = shalt.err (!%p2280_p1)
}
  0x24   :  { %25 = dma.hbm_to_vmem [thread:$0]  %s2514_s0, 64, %s23_s16, [#allocation3]  }
  0x25   :  { %s2284_s30 = scalar_lea.hbm %s2517_s3, 16384 }
  0x26   :  { %p2285_p2 = scmp.ne.s32.totalorder %s2517_s3, %s2284_s30  ;;  %p2288_p3 = scmp.lt.u32.totalorder %s2284_s30, %s2517_s3 }
  0x28   :  { %p2290_p4 = pnand %p2288_p3, %p2285_p2 }
  0x2a   :  { %2293 = shalt.err (!%p2290_p4)
}
  0x2b   :  { %s2294_s14 = scalar_lea.vmem %s46_s18, 16384  ;;  %p2299_p6 = scmp.lt.s32.totalorder %s46_s18, %s46_s18 }
  0x2c   :  { %p2295_p5 = scmp.ne.s32.totalorder %s46_s18, %s2294_s14  ;;  %p2300_p7 = scmp.lt.s32.totalorder %s2294_s14, %s2294_s14 }
  0x2e   :  { %p2301_p8 = por %p2300_p7, %p2299_p6 }
  0x30   :  { %p2302_p9 = pnand %p2301_p8, %p2295_p5 }
  0x32   :  { %2305 = shalt.err (!%p2302_p9)
}
  0x33   :  { %51 = dma.hbm_to_vmem [thread:$0]  %s2517_s3, 16384, %s46_s18, [#allocation6], %s2359_s11, %s2359_s11, %s2360_s12  }
  0x34   :  { %s2363_s16 = smov [#allocation8]   ;;  %s2306_s21 = scalar_lea.hbm %s2519_s5, 4096 }
  0x35   :  { %s59_s17 = sshll.u32 %s2363_s16, 4  ;;  %p2307_p10 = scmp.ne.s32.totalorder %s2519_s5, %s2306_s21  ;;  %s60_s17 = int_to_ptr.vmem [resolvable:$true] %s59_s17 }
  0x36   :  { %p2310_p11 = scmp.lt.u32.totalorder %s2306_s21, %s2519_s5 }
  0x38   :  { %p2312_p12 = pnand %p2310_p11, %p2307_p10 }
  0x3a   :  { %2315 = shalt.err (!%p2312_p12)
}
  0x3b   :  { %s2316_s1 = scalar_lea.vmem %s60_s17, 4096  ;;  %p2321_p0 = scmp.lt.s32.totalorder %s60_s17, %s60_s17 }
  0x3c   :  { %p2317_p13 = scmp.ne.s32.totalorder %s60_s17, %s2316_s1  ;;  %p2322_p1 = scmp.lt.s32.totalorder %s2316_s1, %s2316_s1 }
  0x3e   :  { %p2323_p2 = por %p2322_p1, %p2321_p0 }
  0x40   :  { %p2324_p3 = pnand %p2323_p2, %p2317_p13 }
  0x42   :  { %2327 = shalt.err (!%p2324_p3)
}
  0x43   :  { %s2364_s3 = smov 64   ;;  %s2365_s11 = smov 4  }
  0x44   :  { %65 = dma.hbm_to_vmem [thread:$0]  %s2519_s5, 4096, %s60_s17, [#allocation9], %s2364_s3, %s2364_s3, %s2365_s11  }
  0x45   :  { %2350 = dma.done.wait [#allocation3], 64  }
  0x46   :  { %2351 = vsyncadd [#allocation3], 4294967232 }
  0x47   :  { %2352 = dma.done.wait [#allocation6], 20480  }
  0x48   :  { %2353 = vsyncadd [#allocation6], 4294946816 }
  0x49   :  { %2354 = dma.done.wait [#allocation9], 4096  }
  0x4a   :  { %2355 = vsyncadd [#allocation9], 4294963200  ;;  %v2366_v0 = vmov 0   ;;  %v1968_v1 = vld [vmem:[#allocation5 + $0x4] ss:$16 sps:$4 sm:$0xff]   ;;  %s2367_s29 = smov [#allocation10]  }
  0x4b   :  { %328 = vmatprep.mubr.bf16.mxu0 %v2366_v0  ;;  %369 = vmatprep.mubr.bf16.mxu1 %v2366_v0  ;;  %v1970_v2 = vld [vmem:[#allocation5] ss:$16 sps:$4 sm:$0xff]   ;;  %v1971_v3 = vld [vmem:[#allocation5 + $0x24] ss:$16 sps:$4 sm:$0xff]   ;;  %v1992_v10 = vld [vmem:[#allocation5 + $0xc] ss:$16 sps:$4 sm:$0xff]  }
  0x4c   :  { %296 = vmatprep.subr.bf16.mxu0 %v1968_v1  ;;  %v1973_v4 = vld [vmem:[#allocation5 + $0x20] ss:$16 sps:$4 sm:$0xff]   ;;  %v1974_v5 = vld [vmem:[#allocation5 + $0x44] ss:$16 sps:$4 sm:$0xff]   ;;  %v1994_v11 = vld [vmem:[#allocation5 + $0x8] ss:$16 sps:$4 sm:$0xff]   ;;  %337 = vmatprep.subr.bf16.mxu1 %v1992_v10 }
  0x4d   :  { %297 = vmatpush1.bf16.msra.mxu0 %v1970_v2  ;;  %v1976_v6 = vld [vmem:[#allocation5 + $0x40] ss:$16 sps:$4 sm:$0xff]   ;;  %v1977_v7 = vld [vmem:[#allocation5 + $0x64] ss:$16 sps:$4 sm:$0xff]   ;;  %v1995_v12 = vld [vmem:[#allocation5 + $0x2c] ss:$16 sps:$4 sm:$0xff]   ;;  %338 = vmatpush1.bf16.msra.mxu1 %v1994_v11 }
  0x4e   :  { %298 = vmatprep.subr.bf16.mxu0 %v1971_v3  ;;  %v1979_v8 = vld [vmem:[#allocation5 + $0x60] ss:$16 sps:$4 sm:$0xff]   ;;  %v1980_v9 = vld [vmem:[#allocation5 + $0x84] ss:$16 sps:$4 sm:$0xff]   ;;  %v1997_v14 = vld [vmem:[#allocation5 + $0x28] ss:$16 sps:$4 sm:$0xff]   ;;  %339 = vmatprep.subr.bf16.mxu1 %v1995_v12 }
  0x4f   :  { %v1982_v13 = vld [vmem:[#allocation5 + $0x80] ss:$16 sps:$4 sm:$0xff]   ;;  %v1998_v15 = vld [vmem:[#allocation5 + $0x4c] ss:$16 sps:$4 sm:$0xff]   ;;  %v1983_v16 = vld [vmem:[#allocation5 + $0xa4] ss:$16 sps:$4 sm:$0xff]  }
  0x50   :  { %v1985_v17 = vld [vmem:[#allocation5 + $0xa0] ss:$16 sps:$4 sm:$0xff]   ;;  %v2000_v18 = vld [vmem:[#allocation5 + $0x48] ss:$16 sps:$4 sm:$0xff]   ;;  %v2001_v19 = vld [vmem:[#allocation5 + $0x6c] ss:$16 sps:$4 sm:$0xff]  }
  0x51   :  { %299 = vmatpush1.bf16.msra.mxu0 %v1973_v4  ;;  %340 = vmatpush1.bf16.msra.mxu1 %v1997_v14  ;;  %v1986_v20 = vld [vmem:[#allocation5 + $0xc4] ss:$16 sps:$4 sm:$0xff]   ;;  %v1988_v21 = vld [vmem:[#allocation5 + $0xc0] ss:$16 sps:$4 sm:$0xff]   ;;  %v2003_v22 = vld [vmem:[#allocation5 + $0x68] ss:$16 sps:$4 sm:$0xff]  }
  0x52   :  { %300 = vmatprep.subr.bf16.mxu0 %v1974_v5  ;;  %341 = vmatprep.subr.bf16.mxu1 %v1998_v15  ;;  %v2004_v23 = vld [vmem:[#allocation5 + $0x8c] ss:$16 sps:$4 sm:$0xff]   ;;  %v1989_v24 = vld [vmem:[#allocation5 + $0xe4] ss:$16 sps:$4 sm:$0xff]   ;;  %v1991_v25 = vld [vmem:[#allocation5 + $0xe0] ss:$16 sps:$4 sm:$0xff]  }
  0x53   :  { %v2006_v26 = vld [vmem:[#allocation5 + $0x88] ss:$16 sps:$4 sm:$0xff]   ;;  %v2007_v27 = vld [vmem:[#allocation5 + $0xac] ss:$16 sps:$4 sm:$0xff]   ;;  %v2018_v28 = vld [vmem:[#allocation7 + $0x4] ss:$16 sps:$4 sm:$0xff]  }
  0x54   :  { %v81_v29 = vld [vmem:[#allocation2] sm:$0xf]  ;;  %v2009_v30 = vld [vmem:[#allocation5 + $0xa8] ss:$16 sps:$4 sm:$0xff]   ;;  %v2016_v32 = vld [vmem:[#allocation7] ss:$16 sps:$4 sm:$0xff]  }
  0x55   :  { %301 = vmatpush1.bf16.msra.mxu0 %v1976_v6  ;;  %342 = vmatpush1.bf16.msra.mxu1 %v2000_v18  ;;  %v2010_v31 = vld [vmem:[#allocation5 + $0xcc] ss:$16 sps:$4 sm:$0xff]   ;;  %v2024_v33 = vld [vmem:[#allocation7 + $0x24] ss:$16 sps:$4 sm:$0xff]   ;;  %v2012_v34 = vld [vmem:[#allocation5 + $0xc8] ss:$16 sps:$4 sm:$0xff]  }
  0x56   :  { %302 = vmatprep.subr.bf16.mxu0 %v1977_v7  ;;  %343 = vmatprep.subr.bf16.mxu1 %v2001_v19  ;;  %v2013_v35 = vld [vmem:[#allocation5 + $0xec] ss:$16 sps:$4 sm:$0xff]   ;;  %v2022_v36 = vld [vmem:[#allocation7 + $0x20] ss:$16 sps:$4 sm:$0xff]   ;;  %v2030_v37 = vld [vmem:[#allocation7 + $0x44] ss:$16 sps:$4 sm:$0xff]  }
  0x57   :  { %v2015_v38 = vld [vmem:[#allocation5 + $0xe8] ss:$16 sps:$4 sm:$0xff]   ;;  %v2021_v39 = vld [vmem:[#allocation7 + $0xc] ss:$16 sps:$4 sm:$0xff]   ;;  %v2028_v40 = vld [vmem:[#allocation7 + $0x40] ss:$16 sps:$4 sm:$0xff]  }
  0x58   :  { %v2036_v41 = vld [vmem:[#allocation7 + $0x64] ss:$16 sps:$4 sm:$0xff]   ;;  %v2019_v42 = vld [vmem:[#allocation7 + $0x8] ss:$16 sps:$4 sm:$0xff]   ;;  %v2027_v43 = vld [vmem:[#allocation7 + $0x2c] ss:$16 sps:$4 sm:$0xff]  }
  0x59   :  { %303 = vmatpush1.bf16.msra.mxu0 %v1979_v8  ;;  %344 = vmatpush1.bf16.msra.mxu1 %v2003_v22  ;;  %v2034_v44 = vld [vmem:[#allocation7 + $0x60] ss:$16 sps:$4 sm:$0xff]   ;;  %v2042_v45 = vld [vmem:[#allocation7 + $0x84] ss:$16 sps:$4 sm:$0xff]   ;;  %v2025_v46 = vld [vmem:[#allocation7 + $0x28] ss:$16 sps:$4 sm:$0xff]  }
  0x5a   :  { %304 = vmatprep.subr.bf16.mxu0 %v1980_v9  ;;  %345 = vmatprep.subr.bf16.mxu1 %v2004_v23  ;;  %v2033_v47 = vld [vmem:[#allocation7 + $0x4c] ss:$16 sps:$4 sm:$0xff]   ;;  %v2040_v48 = vld [vmem:[#allocation7 + $0x80] ss:$16 sps:$4 sm:$0xff]   ;;  %v2048_v49 = vld [vmem:[#allocation7 + $0xa4] ss:$16 sps:$4 sm:$0xff]  }
  0x5b   :  { %v2031_v50 = vld [vmem:[#allocation7 + $0x48] ss:$16 sps:$4 sm:$0xff]   ;;  %v2039_v51 = vld [vmem:[#allocation7 + $0x6c] ss:$16 sps:$4 sm:$0xff]   ;;  %v2046_v52 = vld [vmem:[#allocation7 + $0xa0] ss:$16 sps:$4 sm:$0xff]  }
  0x5c   :  { %v2054_v53 = vld [vmem:[#allocation7 + $0xc4] ss:$16 sps:$4 sm:$0xff]   ;;  %v2037_v54 = vld [vmem:[#allocation7 + $0x68] ss:$16 sps:$4 sm:$0xff]   ;;  %v2045_v55 = vld [vmem:[#allocation7 + $0x8c] ss:$16 sps:$4 sm:$0xff]  }
  0x5d   :  { %305 = vmatpush1.bf16.msra.mxu0 %v1982_v13  ;;  %346 = vmatpush1.bf16.msra.mxu1 %v2006_v26  ;;  %v2052_v56 = vld [vmem:[#allocation7 + $0xc0] ss:$16 sps:$4 sm:$0xff]   ;;  %v2060_v57 = vld [vmem:[#allocation7 + $0xe4] ss:$16 sps:$4 sm:$0xff]   ;;  %v2043_v58 = vld [vmem:[#allocation7 + $0x88] ss:$16 sps:$4 sm:$0xff]  }
  0x5e   :  { %306 = vmatprep.subr.bf16.mxu0 %v1983_v16  ;;  %347 = vmatprep.subr.bf16.mxu1 %v2007_v27  ;;  %v2051_v59 = vld [vmem:[#allocation7 + $0xac] ss:$16 sps:$4 sm:$0xff]   ;;  %v2058_v60 = vld [vmem:[#allocation7 + $0xe0] ss:$16 sps:$4 sm:$0xff]   ;;  %v2066_v61 = vld [vmem:[#allocation7 + $0x104] ss:$16 sps:$4 sm:$0xff]  }
  0x5f   :  { %v2049_v62 = vld [vmem:[#allocation7 + $0xa8] ss:$16 sps:$4 sm:$0xff]   ;;  %v2057_v63 = vld [vmem:[#allocation7 + $0xcc] ss:$16 sps:$4 sm:$0xff]   ;;  %v2064_v0 = vld [vmem:[#allocation7 + $0x100] ss:$16 sps:$4 sm:$0xff]  }
  0x60   :  { %v2072_v1 = vld [vmem:[#allocation7 + $0x124] ss:$16 sps:$4 sm:$0xff]   ;;  %v2055_v2 = vld [vmem:[#allocation7 + $0xc8] ss:$16 sps:$4 sm:$0xff]   ;;  %v2063_v3 = vld [vmem:[#allocation7 + $0xec] ss:$16 sps:$4 sm:$0xff]  }
  0x61   :  { %307 = vmatpush1.bf16.msra.mxu0 %v1985_v17  ;;  %348 = vmatpush1.bf16.msra.mxu1 %v2009_v30  ;;  %v2070_v4 = vld [vmem:[#allocation7 + $0x120] ss:$16 sps:$4 sm:$0xff]   ;;  %v2078_v5 = vld [vmem:[#allocation7 + $0x144] ss:$16 sps:$4 sm:$0xff]   ;;  %v2061_v6 = vld [vmem:[#allocation7 + $0xe8] ss:$16 sps:$4 sm:$0xff]  }
  0x62   :  { %308 = vmatprep.subr.bf16.mxu0 %v1986_v20  ;;  %349 = vmatprep.subr.bf16.mxu1 %v2010_v31  ;;  %v2069_v7 = vld [vmem:[#allocation7 + $0x10c] ss:$16 sps:$4 sm:$0xff]   ;;  %v2076_v8 = vld [vmem:[#allocation7 + $0x140] ss:$16 sps:$4 sm:$0xff]   ;;  %v2084_v9 = vld [vmem:[#allocation7 + $0x164] ss:$16 sps:$4 sm:$0xff]  }
  0x63   :  { %v2067_v10 = vld [vmem:[#allocation7 + $0x108] ss:$16 sps:$4 sm:$0xff]   ;;  %v2075_v11 = vld [vmem:[#allocation7 + $0x12c] ss:$16 sps:$4 sm:$0xff]   ;;  %v2082_v12 = vld [vmem:[#allocation7 + $0x160] ss:$16 sps:$4 sm:$0xff]  }
  0x64   :  { %v2090_v13 = vld [vmem:[#allocation7 + $0x184] ss:$16 sps:$4 sm:$0xff]   ;;  %v2073_v14 = vld [vmem:[#allocation7 + $0x128] ss:$16 sps:$4 sm:$0xff]   ;;  %v2081_v15 = vld [vmem:[#allocation7 + $0x14c] ss:$16 sps:$4 sm:$0xff]  }
  0x65   :  { %309 = vmatpush1.bf16.msra.mxu0 %v1988_v21  ;;  %350 = vmatpush1.bf16.msra.mxu1 %v2012_v34  ;;  %v2088_v16 = vld [vmem:[#allocation7 + $0x180] ss:$16 sps:$4 sm:$0xff]   ;;  %v2096_v17 = vld [vmem:[#allocation7 + $0x1a4] ss:$16 sps:$4 sm:$0xff]   ;;  %v2079_v18 = vld [vmem:[#allocation7 + $0x148] ss:$16 sps:$4 sm:$0xff]  }
  0x66   :  { %310 = vmatprep.subr.bf16.mxu0 %v1989_v24  ;;  %351 = vmatprep.subr.bf16.mxu1 %v2013_v35  ;;  %v2087_v19 = vld [vmem:[#allocation7 + $0x16c] ss:$16 sps:$4 sm:$0xff]   ;;  %v2094_v20 = vld [vmem:[#allocation7 + $0x1a0] ss:$16 sps:$4 sm:$0xff]   ;;  %v2085_v21 = vld [vmem:[#allocation7 + $0x168] ss:$16 sps:$4 sm:$0xff]  }
  0x67   :  { %v2093_v22 = vld [vmem:[#allocation7 + $0x18c] ss:$16 sps:$4 sm:$0xff]   ;;  %v2091_v23 = vld [vmem:[#allocation7 + $0x188] ss:$16 sps:$4 sm:$0xff]   ;;  %v2102_v26 = vld [vmem:[#allocation7 + $0x1c4] ss:$16 sps:$4 sm:$0xff]  }
  0x68   :  { %v2099_v24 = vld [vmem:[#allocation7 + $0x1ac] ss:$16 sps:$4 sm:$0xff]   ;;  %v2108_v30 = vld [vmem:[#allocation7 + $0x1e4] ss:$16 sps:$4 sm:$0xff]   ;;  %s1698_s30 = sshll.u32 %s2367_s29, 4  ;;  %s1699_s30 = int_to_ptr.vmem [resolvable:$true] %s1698_s30 }
  0x69   :  { %311 = vmatpush1.bf16.msra.mxu0 %v1991_v25  ;;  %352 = vmatpush1.bf16.msra.mxu1 %v2015_v38  ;;  %v2097_v25 = vld [vmem:[#allocation7 + $0x1a8] ss:$16 sps:$4 sm:$0xff]   ;;  %v2105_v27 = vld [vmem:[#allocation7 + $0x1cc] ss:$16 sps:$4 sm:$0xff]   ;;  %v2114_v34 = vld [vmem:[#allocation7 + $0x204] ss:$16 sps:$4 sm:$0xff]   ;;  %p2333_p5 = scmp.lt.s32.totalorder %s1699_s30, %s1699_s30 }
  0x6a   :  { %1176 = vmatprep.subr.bf16.mxu0 %v2018_v28  ;;  %1258 = vmatprep.subr.bf16.mxu1 %v2021_v39  ;;  %v2100_v28 = vld [vmem:[#allocation7 + $0x1c0] ss:$16 sps:$4 sm:$0xff]   ;;  %v2111_v31 = vld [vmem:[#allocation7 + $0x1ec] ss:$16 sps:$4 sm:$0xff]   ;;  %s2328_s8 = scalar_lea.vmem %s1699_s30, 128 }
  0x6b   :  { %v2117_v35 = vld [vmem:[#allocation7 + $0x20c] ss:$16 sps:$4 sm:$0xff]   ;;  %p2329_p4 = scmp.ne.s32.totalorder %s1699_s30, %s2328_s8  ;;  %p2334_p6 = scmp.lt.s32.totalorder %s2328_s8, %s2328_s8 }
  0x6c   :  { %329 = vmatmul.mubr.bf16.vlgmr.msra.gmra.mrb[0].mxu0 %v81_v29  ;;  %370 = vmatmul.mubr.bf16.vlgmr.msra.gmra.mrb[0].mxu1 %v81_v29  ;;  %v2103_v29 = vld [vmem:[#allocation7 + $0x1c8] ss:$16 sps:$4 sm:$0xff]   ;;  %v2468_v39 = vld [vmem:[%s2516_s2] sm:$0xf] }
  0x6d   :  { %1177 = vmatpush1.bf16.msra.mxu0 %v2016_v32  ;;  %1259 = vmatpush1.bf16.msra.mxu1 %v2019_v42  ;;  %v2106_v32 = vld [vmem:[#allocation7 + $0x1e0] ss:$16 sps:$4 sm:$0xff]   ;;  %p2335_p7 = por %p2334_p6, %p2333_p5 }
  0x6e   :  { %1178 = vmatprep.subr.bf16.mxu0 %v2024_v33  ;;  %1260 = vmatprep.subr.bf16.mxu1 %v2027_v43  ;;  %v2109_v33 = vld [vmem:[#allocation7 + $0x1e8] ss:$16 sps:$4 sm:$0xff]  }
  0x6f   :  { %p2336_p8 = pnand %p2335_p7, %p2329_p4 }
  0x71   :  { %1179 = vmatpush1.bf16.msra.mxu0 %v2022_v36  ;;  %1261 = vmatpush1.bf16.msra.mxu1 %v2025_v46  ;;  %v116_v36 = vlaneseq }
  0x72   :  { %1180 = vmatprep.subr.bf16.mxu0 %v2030_v37  ;;  %1262 = vmatprep.subr.bf16.mxu1 %v2033_v47 }
  0x73   :  { %v2462_v37 = vshrl.u32 %v116_v36, 7  ;;  %v2174_v36 = vld [vmem:[#allocation7 + $0x344] ss:$16 sps:$4 sm:$0xff]  }
  0x75   :  { %1181 = vmatpush1.bf16.msra.mxu0 %v2028_v40  ;;  %1263 = vmatpush1.bf16.msra.mxu1 %v2031_v50  ;;  %v118_v38 = vsub.s32 0, %v2462_v37  ;;  %v122_v40 = vsub.s32 1, %v2462_v37 }
  0x76   :  { %1182 = vmatprep.subr.bf16.mxu0 %v2036_v41  ;;  %1264 = vmatprep.subr.bf16.mxu1 %v2039_v51  ;;  %v130_v51 = vsub.s32 3, %v2462_v37 }
  0x77   :  { %v119_v41 = vrot.slane %v2468_v39, %v118_v38  ;;  %v123_v42 = vrot.slane %v2468_v39, %v122_v40 }
  0x79   :  { %1183 = vmatpush1.bf16.msra.mxu0 %v2034_v44  ;;  %1265 = vmatpush1.bf16.msra.mxu1 %v2037_v54  ;;  %v2115_v54 = vld [vmem:[#allocation7 + $0x208] ss:$16 sps:$4 sm:$0xff]  }
  0x7a   :  { %1184 = vmatprep.subr.bf16.mxu0 %v2042_v45  ;;  %1266 = vmatprep.subr.bf16.mxu1 %v2045_v55 }
  0x7d   :  { %1185 = vmatpush1.bf16.msra.mxu0 %v2040_v48  ;;  %1267 = vmatpush1.bf16.msra.mxu1 %v2043_v58  ;;  %v131_v58 = vrot.slane %v2468_v39, %v130_v51 }
  0x7e   :  { %1186 = vmatprep.subr.bf16.mxu0 %v2048_v49  ;;  %1268 = vmatprep.subr.bf16.mxu1 %v2051_v59  ;;  %v2118_v59 = vld [vmem:[#allocation7 + $0x220] ss:$16 sps:$4 sm:$0xff]  }
  0x81   :  { %1187 = vmatpush1.bf16.msra.mxu0 %v2046_v52  ;;  %1269 = vmatpush1.bf16.msra.mxu1 %v2049_v62  ;;  %v2129_v62 = vld [vmem:[#allocation7 + $0x24c] ss:$16 sps:$4 sm:$0xff]  }
  0x82   :  { %1188 = vmatprep.subr.bf16.mxu0 %v2054_v53  ;;  %1270 = vmatprep.subr.bf16.mxu1 %v2057_v63  ;;  %v2112_v53 = vld [vmem:[#allocation7 + $0x200] ss:$16 sps:$4 sm:$0xff]  }
  0x85   :  { %1189 = vmatpush1.bf16.msra.mxu0 %v2052_v56  ;;  %1271 = vmatpush1.bf16.msra.mxu1 %v2055_v2  ;;  %v2120_v56 = vld [vmem:[#allocation7 + $0x224] ss:$16 sps:$4 sm:$0xff]  }
  0x86   :  { %1190 = vmatprep.subr.bf16.mxu0 %v2060_v57  ;;  %1272 = vmatprep.subr.bf16.mxu1 %v2063_v3  ;;  %v2123_v57 = vld [vmem:[#allocation7 + $0x22c] ss:$16 sps:$4 sm:$0xff]   ;;  %v2124_v3 = vld [vmem:[#allocation7 + $0x240] ss:$16 sps:$4 sm:$0xff]  }
  0x89   :  { %1191 = vmatpush1.bf16.msra.mxu0 %v2058_v60  ;;  %1273 = vmatpush1.bf16.msra.mxu1 %v2061_v6  ;;  %v2121_v60 = vld [vmem:[#allocation7 + $0x228] ss:$16 sps:$4 sm:$0xff]   ;;  %v2132_v6 = vld [vmem:[#allocation7 + $0x264] ss:$16 sps:$4 sm:$0xff]  }
  0x8a   :  { %1192 = vmatprep.subr.bf16.mxu0 %v2066_v61  ;;  %1274 = vmatprep.subr.bf16.mxu1 %v2069_v7  ;;  %v2126_v61 = vld [vmem:[#allocation7 + $0x244] ss:$16 sps:$4 sm:$0xff]   ;;  %v2135_v7 = vld [vmem:[#allocation7 + $0x26c] ss:$16 sps:$4 sm:$0xff]  }
  0x8d   :  { %1193 = vmatpush1.bf16.msra.mxu0 %v2064_v0  ;;  %1275 = vmatpush1.bf16.msra.mxu1 %v2067_v10  ;;  %v2130_v10 = vld [vmem:[#allocation7 + $0x260] ss:$16 sps:$4 sm:$0xff]  }
  0x8e   :  { %1194 = vmatprep.subr.bf16.mxu0 %v2072_v1  ;;  %1276 = vmatprep.subr.bf16.mxu1 %v2075_v11  ;;  %v2133_v11 = vld [vmem:[#allocation7 + $0x268] ss:$16 sps:$4 sm:$0xff]  }
  0x91   :  { %1195 = vmatpush1.bf16.msra.mxu0 %v2070_v4  ;;  %1277 = vmatpush1.bf16.msra.mxu1 %v2073_v14  ;;  %v2127_v4 = vld [vmem:[#allocation7 + $0x248] ss:$16 sps:$4 sm:$0xff]   ;;  %v2136_v14 = vld [vmem:[#allocation7 + $0x280] ss:$16 sps:$4 sm:$0xff]  }
  0x92   :  { %1196 = vmatprep.subr.bf16.mxu0 %v2078_v5  ;;  %1278 = vmatprep.subr.bf16.mxu1 %v2081_v15  ;;  %v2139_v15 = vld [vmem:[#allocation7 + $0x288] ss:$16 sps:$4 sm:$0xff]  }
  0x95   :  { %1197 = vmatpush1.bf16.msra.mxu0 %v2076_v8  ;;  %1279 = vmatpush1.bf16.msra.mxu1 %v2079_v18  ;;  %v2142_v18 = vld [vmem:[#allocation7 + $0x2a0] ss:$16 sps:$4 sm:$0xff]  }
  0x96   :  { %1198 = vmatprep.subr.bf16.mxu0 %v2084_v9  ;;  %1280 = vmatprep.subr.bf16.mxu1 %v2087_v19  ;;  %v2145_v19 = vld [vmem:[#allocation7 + $0x2a8] ss:$16 sps:$4 sm:$0xff]  }
  0x99   :  { %1199 = vmatpush1.bf16.msra.mxu0 %v2082_v12  ;;  %1281 = vmatpush1.bf16.msra.mxu1 %v2085_v21  ;;  %v2138_v12 = vld [vmem:[#allocation7 + $0x284] ss:$16 sps:$4 sm:$0xff]   ;;  %v2153_v21 = vld [vmem:[#allocation7 + $0x2cc] ss:$16 sps:$4 sm:$0xff]  }
  0x9a   :  { %1200 = vmatprep.subr.bf16.mxu0 %v2090_v13  ;;  %1282 = vmatprep.subr.bf16.mxu1 %v2093_v22  ;;  %v2141_v13 = vld [vmem:[#allocation7 + $0x28c] ss:$16 sps:$4 sm:$0xff]   ;;  %v2148_v22 = vld [vmem:[#allocation7 + $0x2c0] ss:$16 sps:$4 sm:$0xff]  }
  0x9d   :  { %1201 = vmatpush1.bf16.msra.mxu0 %v2088_v16  ;;  %1283 = vmatpush1.bf16.msra.mxu1 %v2091_v23  ;;  %v2144_v16 = vld [vmem:[#allocation7 + $0x2a4] ss:$16 sps:$4 sm:$0xff]   ;;  %v2151_v23 = vld [vmem:[#allocation7 + $0x2c8] ss:$16 sps:$4 sm:$0xff]  }
  0x9e   :  { %1202 = vmatprep.subr.bf16.mxu0 %v2096_v17  ;;  %1284 = vmatprep.subr.bf16.mxu1 %v2099_v24  ;;  %v2147_v17 = vld [vmem:[#allocation7 + $0x2ac] ss:$16 sps:$4 sm:$0xff]   ;;  %v2156_v24 = vld [vmem:[#allocation7 + $0x2e4] ss:$16 sps:$4 sm:$0xff]  }
  0xa1   :  { %1203 = vmatpush1.bf16.msra.mxu0 %v2094_v20  ;;  %1285 = vmatpush1.bf16.msra.mxu1 %v2097_v25  ;;  %v2150_v20 = vld [vmem:[#allocation7 + $0x2c4] ss:$16 sps:$4 sm:$0xff]   ;;  %v2159_v25 = vld [vmem:[#allocation7 + $0x2ec] ss:$16 sps:$4 sm:$0xff]  }
  0xa2   :  { %1204 = vmatprep.subr.bf16.mxu0 %v2102_v26  ;;  %1286 = vmatprep.subr.bf16.mxu1 %v2105_v27  ;;  %v2154_v26 = vld [vmem:[#allocation7 + $0x2e0] ss:$16 sps:$4 sm:$0xff]   ;;  %v2157_v27 = vld [vmem:[#allocation7 + $0x2e8] ss:$16 sps:$4 sm:$0xff]  }
  0xa5   :  { %1205 = vmatpush1.bf16.msra.mxu0 %v2100_v28  ;;  %1287 = vmatpush1.bf16.msra.mxu1 %v2103_v29  ;;  %v2162_v28 = vld [vmem:[#allocation7 + $0x304] ss:$16 sps:$4 sm:$0xff]   ;;  %v2165_v29 = vld [vmem:[#allocation7 + $0x30c] ss:$16 sps:$4 sm:$0xff]  }
  0xa6   :  { %1206 = vmatprep.subr.bf16.mxu0 %v2108_v30  ;;  %1288 = vmatprep.subr.bf16.mxu1 %v2111_v31  ;;  %v2160_v30 = vld [vmem:[#allocation7 + $0x300] ss:$16 sps:$4 sm:$0xff]   ;;  %v2163_v31 = vld [vmem:[#allocation7 + $0x308] ss:$16 sps:$4 sm:$0xff]  }
  0xa9   :  { %1207 = vmatpush1.bf16.msra.mxu0 %v2106_v32  ;;  %1289 = vmatpush1.bf16.msra.mxu1 %v2109_v33  ;;  %v2168_v32 = vld [vmem:[#allocation7 + $0x324] ss:$16 sps:$4 sm:$0xff]   ;;  %v2171_v33 = vld [vmem:[#allocation7 + $0x32c] ss:$16 sps:$4 sm:$0xff]  }
  0xaa   :  { %1217 = vmatprep.subr.bf16.mxu0 %v2114_v34  ;;  %1299 = vmatprep.subr.bf16.mxu1 %v2117_v35  ;;  %v2166_v34 = vld [vmem:[#allocation7 + $0x320] ss:$16 sps:$4 sm:$0xff]   ;;  %v2169_v35 = vld [vmem:[#allocation7 + $0x328] ss:$16 sps:$4 sm:$0xff]  }
 0x13f   :  { %v330_v43 = vpop.f32.mrb[0].mxu0  ;;  %v2481_v63 = vpop.f32.mrb[0].mxu1 }
 0x140   :  { %v331_v44 = vadd.f32 %v330_v43, %v119_v41  ;;  %v332_v45 = vpop.f32.mrb[1].mxu0  ;;  %v373_v0 = vpop.f32.mrb[1].mxu1  ;;  %v2177_v41 = vld [vmem:[#allocation7 + $0x34c] ss:$16 sps:$4 sm:$0xff]   ;;  %v2175_v43 = vld [vmem:[#allocation7 + $0x348] ss:$16 sps:$4 sm:$0xff]  }
 0x141   :  { %v333_v46 = vadd.f32 %v332_v45, %v123_v42  ;;  %v334_v47 = vpop.f32.mrb[2].mxu0  ;;  %v374_v1 = vadd.f32 %v373_v0, %v131_v58  ;;  %v375_v2 = vpop.f32.mrb[2].mxu1  ;;  %v2172_v42 = vld [vmem:[#allocation7 + $0x340] ss:$16 sps:$4 sm:$0xff]   ;;  %v2183_v45 = vld [vmem:[#allocation7 + $0x36c] ss:$16 sps:$4 sm:$0xff]  }
 0x142   :  { %v378_v48 = vmax.f32 %v331_v44, 0.0  ;;  %v335_v49 = vpop.f32.mrb[3].mxu0  ;;  %v376_v5 = vpop.f32.mrb[3].mxu1  ;;  %v2180_v44 = vld [vmem:[#allocation7 + $0x364] ss:$16 sps:$4 sm:$0xff]  }
 0x143   :  { %v379_v50 = vmax.f32 %v333_v46, 0.0  ;;  %v381_v8 = vmax.f32 %v374_v1, 0.0  ;;  %v2178_v46 = vld [vmem:[#allocation7 + $0x360] ss:$16 sps:$4 sm:$0xff]   ;;  %v2181_v47 = vld [vmem:[#allocation7 + $0x368] ss:$16 sps:$4 sm:$0xff]  }
 0x144   :  { %v382_v55 = vpack.c.bf16 %v378_v48, %v378_v48  ;;  %v2186_v48 = vld [vmem:[#allocation7 + $0x384] ss:$16 sps:$4 sm:$0xff]   ;;  %v2189_v49 = vld [vmem:[#allocation7 + $0x38c] ss:$16 sps:$4 sm:$0xff]  }
 0x145   :  { %v383_v52 = vpack.c.bf16 %v379_v50, %v379_v50  ;;  %v385_v9 = vpack.c.bf16 %v381_v8, %v381_v8  ;;  %v2184_v50 = vld [vmem:[#allocation7 + $0x380] ss:$16 sps:$4 sm:$0xff]   ;;  %v2204_v1 = vld [vmem:[#allocation7 + $0x3e4] ss:$16 sps:$4 sm:$0xff]   ;;  %v2207_v2 = vld [vmem:[#allocation7 + $0x3ec] ss:$16 sps:$4 sm:$0xff]  }
 0x146   :  { %v2211_v8 = vld [vmem:[#allocation8 + $0x80] sm:$0xff]  }
 0x147   :  { %1208 = vmatprep.mubr.bf16.mxu0 %v383_v52  ;;  %1290 = vmatprep.mubr.bf16.mxu1 %v383_v52  ;;  %v2187_v52 = vld [vmem:[#allocation7 + $0x388] ss:$16 sps:$4 sm:$0xff]  }
 0x148   :  { %1209 = vmatmul.mubr.bf16.vlgmr.msra.gmra.mrb[4].mxu0 %v382_v55  ;;  %1291 = vmatmul.mubr.bf16.vlgmr.msra.gmra.mrb[4].mxu1 %v382_v55  ;;  %v2195_v55 = vld [vmem:[#allocation7 + $0x3ac] ss:$16 sps:$4 sm:$0xff]  }
 0x149   :  { %1218 = vmatpush1.bf16.msra.mxu0 %v2112_v53  ;;  %1300 = vmatpush1.bf16.msra.mxu1 %v2115_v54  ;;  %v126_v53 = vsub.s32 2, %v2462_v37  ;;  %v2192_v54 = vld [vmem:[#allocation7 + $0x3a4] ss:$16 sps:$4 sm:$0xff]  }
 0x14a   :  { %1219 = vmatprep.subr.bf16.mxu0 %v2120_v56  ;;  %1301 = vmatprep.subr.bf16.mxu1 %v2123_v57  ;;  %v2190_v56 = vld [vmem:[#allocation7 + $0x3a0] ss:$16 sps:$4 sm:$0xff]   ;;  %v2193_v57 = vld [vmem:[#allocation7 + $0x3a8] ss:$16 sps:$4 sm:$0xff]  }
 0x14b   :  { %1249 = vmatprep.mubr.bf16.mxu0 %v385_v9  ;;  %1331 = vmatprep.mubr.bf16.mxu1 %v385_v9  ;;  %v127_v58 = vrot.slane %v2468_v39, %v126_v53  ;;  %v2208_v39 = vld [vmem:[#allocation8 + $0x40] sm:$0xff]  }
 0x14d   :  { %1220 = vmatpush1.bf16.msra.mxu0 %v2118_v59  ;;  %1302 = vmatpush1.bf16.msra.mxu1 %v2121_v60  ;;  %v2198_v59 = vld [vmem:[#allocation7 + $0x3c4] ss:$16 sps:$4 sm:$0xff]   ;;  %v2201_v60 = vld [vmem:[#allocation7 + $0x3cc] ss:$16 sps:$4 sm:$0xff]   ;;  %v372_v0 = vadd.f32 %v2481_v63, %v127_v58 }
 0x14e   :  { %1221 = vmatprep.subr.bf16.mxu0 %v2126_v61  ;;  %1303 = vmatprep.subr.bf16.mxu1 %v2129_v62  ;;  %v2196_v61 = vld [vmem:[#allocation7 + $0x3c0] ss:$16 sps:$4 sm:$0xff]   ;;  %v2199_v62 = vld [vmem:[#allocation7 + $0x3c8] ss:$16 sps:$4 sm:$0xff]  }
 0x14f   :  { %v380_v5 = vmax.f32 %v372_v0, 0.0  ;;  %v2212_v63 = vld [vmem:[#allocation8 + $0x48] sm:$0xff]  }
 0x151   :  { %1222 = vmatpush1.bf16.msra.mxu0 %v2124_v3  ;;  %1304 = vmatpush1.bf16.msra.mxu1 %v2127_v4  ;;  %v2202_v3 = vld [vmem:[#allocation7 + $0x3e0] ss:$16 sps:$4 sm:$0xff]   ;;  %v2205_v4 = vld [vmem:[#allocation7 + $0x3e8] ss:$16 sps:$4 sm:$0xff]   ;;  %v384_v9 = vpack.c.bf16 %v380_v5, %v380_v5 }
 0x152   :  { %1223 = vmatprep.subr.bf16.mxu0 %v2132_v6  ;;  %1305 = vmatprep.subr.bf16.mxu1 %v2135_v7  ;;  %v2209_v6 = vld [vmem:[#allocation8 + $0xc0] sm:$0xff]  }
 0x153   :  { %v2210_v7 = vld [vmem:[#allocation8] sm:$0xff]  }
 0x155   :  { %1224 = vmatpush1.bf16.msra.mxu0 %v2130_v10  ;;  %1306 = vmatpush1.bf16.msra.mxu1 %v2133_v11  ;;  %v2213_v10 = vld [vmem:[#allocation8 + $0xc8] sm:$0xff]  }
 0x156   :  { %1225 = vmatprep.subr.bf16.mxu0 %v2138_v12  ;;  %1307 = vmatprep.subr.bf16.mxu1 %v2141_v13  ;;  %v2214_v11 = vld [vmem:[#allocation8 + $0x8] sm:$0xff]   ;;  %v2216_v13 = vld [vmem:[#allocation8 + $0x50] sm:$0xff]  }
 0x157   :  { %v2215_v12 = vld [vmem:[#allocation8 + $0x88] sm:$0xff]  }
 0x159   :  { %1226 = vmatpush1.bf16.msra.mxu0 %v2136_v14  ;;  %1308 = vmatpush1.bf16.msra.mxu1 %v2139_v15  ;;  %v2217_v14 = vld [vmem:[#allocation8 + $0xd0] sm:$0xff]  }
 0x15a   :  { %1227 = vmatprep.subr.bf16.mxu0 %v2144_v16  ;;  %1309 = vmatprep.subr.bf16.mxu1 %v2147_v17  ;;  %v2218_v15 = vld [vmem:[#allocation8 + $0x10] sm:$0xff]   ;;  %v2220_v17 = vld [vmem:[#allocation8 + $0x58] sm:$0xff]  }
 0x15b   :  { %v2219_v16 = vld [vmem:[#allocation8 + $0x90] sm:$0xff]  }
 0x15d   :  { %1228 = vmatpush1.bf16.msra.mxu0 %v2142_v18  ;;  %1310 = vmatpush1.bf16.msra.mxu1 %v2145_v19  ;;  %v2221_v18 = vld [vmem:[#allocation8 + $0xd8] sm:$0xff]  }
 0x15e   :  { %1229 = vmatprep.subr.bf16.mxu0 %v2150_v20  ;;  %1311 = vmatprep.subr.bf16.mxu1 %v2153_v21  ;;  %v2222_v19 = vld [vmem:[#allocation8 + $0x18] sm:$0xff]   ;;  %v2224_v21 = vld [vmem:[#allocation8 + $0x60] sm:$0xff]  }
 0x15f   :  { %v2223_v20 = vld [vmem:[#allocation8 + $0x98] sm:$0xff]  }
 0x161   :  { %1230 = vmatpush1.bf16.msra.mxu0 %v2148_v22  ;;  %1312 = vmatpush1.bf16.msra.mxu1 %v2151_v23  ;;  %v2225_v22 = vld [vmem:[#allocation8 + $0xe0] sm:$0xff]  }
 0x162   :  { %1231 = vmatprep.subr.bf16.mxu0 %v2156_v24  ;;  %1313 = vmatprep.subr.bf16.mxu1 %v2159_v25  ;;  %v2226_v23 = vld [vmem:[#allocation8 + $0x20] sm:$0xff]   ;;  %v2228_v25 = vld [vmem:[#allocation8 + $0x68] sm:$0xff]  }
 0x163   :  { %v2227_v24 = vld [vmem:[#allocation8 + $0xa0] sm:$0xff]  }
 0x165   :  { %1232 = vmatpush1.bf16.msra.mxu0 %v2154_v26  ;;  %1314 = vmatpush1.bf16.msra.mxu1 %v2157_v27  ;;  %v2229_v26 = vld [vmem:[#allocation8 + $0xe8] sm:$0xff]  }
 0x166   :  { %1233 = vmatprep.subr.bf16.mxu0 %v2162_v28  ;;  %1315 = vmatprep.subr.bf16.mxu1 %v2165_v29  ;;  %v2230_v27 = vld [vmem:[#allocation8 + $0x28] sm:$0xff]   ;;  %v2232_v29 = vld [vmem:[#allocation8 + $0x70] sm:$0xff]  }
 0x167   :  { %v2231_v28 = vld [vmem:[#allocation8 + $0xa8] sm:$0xff]  }
 0x169   :  { %1234 = vmatpush1.bf16.msra.mxu0 %v2160_v30  ;;  %1316 = vmatpush1.bf16.msra.mxu1 %v2163_v31  ;;  %v2233_v30 = vld [vmem:[#allocation8 + $0xf0] sm:$0xff]  }
 0x16a   :  { %1235 = vmatprep.subr.bf16.mxu0 %v2168_v32  ;;  %1317 = vmatprep.subr.bf16.mxu1 %v2171_v33  ;;  %v2234_v31 = vld [vmem:[#allocation8 + $0x30] sm:$0xff]   ;;  %v2236_v33 = vld [vmem:[#allocation8 + $0x78] sm:$0xff]  }
 0x16b   :  { %v2235_v32 = vld [vmem:[#allocation8 + $0xb0] sm:$0xff]  }
 0x16d   :  { %1236 = vmatpush1.bf16.msra.mxu0 %v2166_v34  ;;  %1318 = vmatpush1.bf16.msra.mxu1 %v2169_v35  ;;  %v2237_v34 = vld [vmem:[#allocation8 + $0xf8] sm:$0xff]  }
 0x16e   :  { %1237 = vmatprep.subr.bf16.mxu0 %v2174_v36  ;;  %1319 = vmatprep.subr.bf16.mxu1 %v2177_v41  ;;  %v2238_v35 = vld [vmem:[#allocation8 + $0x38] sm:$0xff]  }
 0x16f   :  { %v2239_v36 = vld [vmem:[#allocation8 + $0xb8] sm:$0xff]  }
 0x170   :  { %v514_v41 = vld [vmem:[%s2518_s4] sm:$0xf] }
 0x171   :  { %1238 = vmatpush1.bf16.msra.mxu0 %v2172_v42  ;;  %1320 = vmatpush1.bf16.msra.mxu1 %v2175_v43  ;;  %v519_v42 = vrot.slane %v514_v41, %v118_v38  ;;  %v527_v43 = vrot.slane %v514_v41, %v126_v53 }
 0x172   :  { %1239 = vmatprep.subr.bf16.mxu0 %v2180_v44  ;;  %1321 = vmatprep.subr.bf16.mxu1 %v2183_v45  ;;  %v523_v44 = vrot.slane %v514_v41, %v122_v40  ;;  %v531_v45 = vrot.slane %v514_v41, %v130_v51 }
 0x175   :  { %1240 = vmatpush1.bf16.msra.mxu0 %v2178_v46  ;;  %1322 = vmatpush1.bf16.msra.mxu1 %v2181_v47 }
 0x176   :  { %1241 = vmatprep.subr.bf16.mxu0 %v2186_v48  ;;  %1323 = vmatprep.subr.bf16.mxu1 %v2189_v49 }
 0x179   :  { %1242 = vmatpush1.bf16.msra.mxu0 %v2184_v50  ;;  %1324 = vmatpush1.bf16.msra.mxu1 %v2187_v52 }
 0x17a   :  { %1243 = vmatprep.subr.bf16.mxu0 %v2192_v54  ;;  %1325 = vmatprep.subr.bf16.mxu1 %v2195_v55 }
 0x17d   :  { %1244 = vmatpush1.bf16.msra.mxu0 %v2190_v56  ;;  %1326 = vmatpush1.bf16.msra.mxu1 %v2193_v57 }
 0x17e   :  { %1245 = vmatprep.subr.bf16.mxu0 %v2198_v59  ;;  %1327 = vmatprep.subr.bf16.mxu1 %v2201_v60 }
 0x181   :  { %1246 = vmatpush1.bf16.msra.mxu0 %v2196_v61  ;;  %1328 = vmatpush1.bf16.msra.mxu1 %v2199_v62 }
 0x182   :  { %1247 = vmatprep.subr.bf16.mxu0 %v2204_v1  ;;  %1329 = vmatprep.subr.bf16.mxu1 %v2207_v2  ;;  %v1869_v2 = vld [vmem:[%s2520_s6] ss:$0 sm:$0xff] }
 0x185   :  { %1248 = vmatpush1.bf16.msra.mxu0 %v2202_v3  ;;  %1330 = vmatpush1.bf16.msra.mxu1 %v2205_v4 }
 0x186   :  { %1902 = vmatprep.subr.bf16.mxu0 %v2208_v39  ;;  %1924 = vmatprep.subr.bf16.mxu1 %v2209_v6 }
 0x188   :  { %1250 = vmatmul.mubr.bf16.vlgmr.msra.gmra.mrb[4].mxu0 %v384_v9  ;;  %1332 = vmatmul.mubr.bf16.vlgmr.msra.gmra.mrb[4].mxu1 %v384_v9 }
 0x189   :  { %1903 = vmatpush3.bf16.msra.mxu0 %v2210_v7  ;;  %1925 = vmatpush3.bf16.msra.mxu1 %v2211_v8 }
 0x18a   :  { %1904 = vmatprep.subr.bf16.mxu0 %v2212_v63  ;;  %1926 = vmatprep.subr.bf16.mxu1 %v2213_v10 }
 0x18d   :  { %1905 = vmatpush3.bf16.msra.mxu0 %v2214_v11  ;;  %1927 = vmatpush3.bf16.msra.mxu1 %v2215_v12 }
 0x18e   :  { %1906 = vmatprep.subr.bf16.mxu0 %v2216_v13  ;;  %1928 = vmatprep.subr.bf16.mxu1 %v2217_v14 }
 0x191   :  { %1907 = vmatpush3.bf16.msra.mxu0 %v2218_v15  ;;  %1929 = vmatpush3.bf16.msra.mxu1 %v2219_v16 }
 0x192   :  { %1908 = vmatprep.subr.bf16.mxu0 %v2220_v17  ;;  %1930 = vmatprep.subr.bf16.mxu1 %v2221_v18 }
 0x195   :  { %1909 = vmatpush3.bf16.msra.mxu0 %v2222_v19  ;;  %1931 = vmatpush3.bf16.msra.mxu1 %v2223_v20 }
 0x196   :  { %1910 = vmatprep.subr.bf16.mxu0 %v2224_v21  ;;  %1932 = vmatprep.subr.bf16.mxu1 %v2225_v22 }
 0x199   :  { %1911 = vmatpush3.bf16.msra.mxu0 %v2226_v23  ;;  %1933 = vmatpush3.bf16.msra.mxu1 %v2227_v24 }
 0x19a   :  { %1912 = vmatprep.subr.bf16.mxu0 %v2228_v25  ;;  %1934 = vmatprep.subr.bf16.mxu1 %v2229_v26 }
 0x19d   :  { %1913 = vmatpush3.bf16.msra.mxu0 %v2230_v27  ;;  %1935 = vmatpush3.bf16.msra.mxu1 %v2231_v28 }
 0x19e   :  { %1914 = vmatprep.subr.bf16.mxu0 %v2232_v29  ;;  %1936 = vmatprep.subr.bf16.mxu1 %v2233_v30 }
 0x1a1   :  { %1915 = vmatpush3.bf16.msra.mxu0 %v2234_v31  ;;  %1937 = vmatpush3.bf16.msra.mxu1 %v2235_v32 }
 0x1a2   :  { %1916 = vmatprep.subr.bf16.mxu0 %v2236_v33  ;;  %1938 = vmatprep.subr.bf16.mxu1 %v2237_v34 }
 0x1a5   :  { %1917 = vmatpush3.bf16.msra.mxu0 %v2238_v35  ;;  %1939 = vmatpush3.bf16.msra.mxu1 %v2239_v36 }
 0x25b   :  { %v1251_v46 = vpop.f32.mrb[4].mxu0  ;;  %v1333_v47 = vpop.f32.mrb[4].mxu1 }
 0x25c   :  { %v1946_v48 = vadd.f32 %v1251_v46, %v519_v42  ;;  %v1948_v49 = vadd.f32 %v1333_v47, %v527_v43  ;;  %v1253_v50 = vpop.f32.mrb[5].mxu0  ;;  %v1335_v52 = vpop.f32.mrb[5].mxu1 }
 0x25d   :  { %v1947_v54 = vadd.f32 %v1253_v50, %v523_v44  ;;  %v1949_v55 = vadd.f32 %v1335_v52, %v531_v45  ;;  %v1255_v56 = vpop.f32.mrb[6].mxu0  ;;  %v1337_v57 = vpop.f32.mrb[6].mxu1 }
 0x25e   :  { %v1340_v38 = vmax.f32 %v1946_v48, 0.0  ;;  %v1342_v58 = vmax.f32 %v1948_v49, 0.0  ;;  %v1256_v59 = vpop.f32.mrb[7].mxu0  ;;  %v1338_v53 = vpop.f32.mrb[7].mxu1 }
 0x25f   :  { %v1341_v60 = vmax.f32 %v1947_v54, 0.0  ;;  %v1343_v61 = vmax.f32 %v1949_v55, 0.0 }
 0x260   :  { %v1344_v37 = vpack.c.bf16 %v1340_v38, %v1340_v38  ;;  %v1346_v51 = vpack.c.bf16 %v1342_v58, %v1342_v58 }
 0x261   :  { %v1345_v40 = vpack.c.bf16 %v1341_v60, %v1341_v60  ;;  %v1347_v62 = vpack.c.bf16 %v1343_v61, %v1343_v61 }
 0x263   :  { %1643 = vmatprep.mubr.bf16.mxu0 %v1345_v40  ;;  %1683 = vmatprep.mubr.bf16.mxu1 %v1347_v62 }
 0x264   :  { %1644 = vmatmul.mubr.bf16.vlgmr.msra.gmra.mrb[8].mxu0 %v1344_v37  ;;  %1684 = vmatmul.mubr.bf16.vlgmr.msra.gmra.mrb[8].mxu1 %v1346_v51 }
 0x337   :  { %v1918_v0 = vpop.f32.mrb[8].mxu0  ;;  %v1940_v1 = vpop.f32.mrb[8].mxu1 }
 0x338   :  { %v1919_v3 = vpop.f32.mrb[9].mxu0  ;;  %v1941_v4 = vpop.f32.mrb[9].mxu1 }
 0x339   :  { %v1920_v5 = vadd.f32 %v1919_v3, %v1918_v0  ;;  %v1942_v39 = vadd.f32 %v1941_v4, %v1940_v1  ;;  %v1921_v6 = vpop.f32.mrb[10].mxu0  ;;  %v1943_v7 = vpop.f32.mrb[10].mxu1 }
 0x33a   :  { %v1922_v8 = vpop.f32.mrb[11].mxu0  ;;  %v1944_v9 = vpop.f32.mrb[11].mxu1 }
 0x33b   :  { %v1646_v63 = vadd.f32 %v1920_v5, %v1869_v2 }
 0x33d   :  { %v1686_v10 = vadd.f32 %v1942_v39, %v1646_v63 }
 0x33f   :  { %1691 = vst [vmem:[#allocation10] sm:$0xff] %v1686_v10 }
 0x340   :  { %2339 = shalt.err (!%p2336_p8)
}
 0x341   :  { %s2340_s10 = scalar_lea.hbm %s2521_s7, 128 }
 0x342   :  { %p2341_p9 = scmp.ne.s32.totalorder %s2521_s7, %s2340_s10  ;;  %p2344_p10 = scmp.lt.u32.totalorder %s2340_s10, %s2521_s7 }
 0x344   :  { %p2346_p11 = pnand %p2344_p10, %p2341_p9 }
 0x346   :  { %2349 = shalt.err (!%p2346_p11)
}
 0x347   :  { %1701 = dma.vmem_to_hbm [thread:$0]  %s1699_s30, 128, %s2521_s7, [#allocation4]  }
 0x348   :  { %2356 = dma.done.wait [#allocation4], 128  }
 0x349   :  { %2357 = vsyncadd [#allocation4], 4294967168 }
 0x34a   :  { %1705 = vsyncpa [#allocation3], 1 }
 0x34b   :  { %1706 = vsyncpa [#allocation6], 1 }
 0x34c   :  { %1707 = vsyncpa [#allocation9], 1 }
 0x34d   :  { %1708 = vsyncpa [#allocation4], 1 }

</bundles_post_ra>
